<compile_context>
chip_gen: v6e
topology: v6e:2x2x1
jax: 0.10.0
libtpu: 0.0.40
codegen_flags: <defaults>
</compile_context>

<pallas_src>
import jax
import jax.numpy as jnp
from jax.experimental import pallas as pl
from jax.experimental.pallas import tpu as pltpu


def _round_up(x, m):
    return ((x + m - 1) // m) * m


def _cdiv(a, b):
    return -(-a // b)


def _vmem_limits():
    """(scoped vmem limit to request, budget for our per-step working set)."""
    phys = 128 << 20
    try:
        info = pltpu.get_tpu_info()
        phys = int(getattr(info, "vmem_capacity_bytes", phys))
    except Exception:
        pass  # fall back to the conservative 128 MiB assumption
    # ~96 MiB on v5e/v6e (128 MiB VMEM), ~48 MiB on v7x (64 MiB/TC); keep
    # headroom for compiler-internal scratch.
    vmem_limit = int(min(96 << 20, (phys * 3) // 4))
    tile_budget = (vmem_limit * 2) // 3
    return vmem_limit, tile_budget


def _choose_tiling(BT, S, D, budget_bytes, min_steps=4):
    """Pick TM (rows per grid step, multiple of 8) and padded BT."""
    # Per-row f32 bytes per step: keys double-buffered (2x S*D) + h/e/acc
    # intermediates (~2x S*D), mask (2x S), out (2x D), plus slack.
    per_row = 4 * (4 * S * D + 3 * S + 3 * D) + 128
    # Shared (constant index_map) W^T and v are still double-buffered.
    fixed = 4 * 2 * (D * D + D)
    avail = max(budget_bytes - fixed, 8 * per_row)
    tm_vmem = max(8, ((avail // per_row) // 8) * 8)
    # Keep >= min_steps grid steps so the auto-pipeline overlaps the keys DMA
    # of step i+1 with compute of step i (and megacore has work to split).
    tm_steps = max(8, _round_up(_cdiv(BT, min_steps), 8))
    TM = int(min(tm_vmem, tm_steps))
    BT_pad = _round_up(BT, TM)
    # Guarantee at least 2 grid steps (v7x has 2 TensorCores); only triggers
    # for tiny BT, where padding one extra tile is negligible.
    if BT_pad // TM < 2:
        BT_pad = 2 * TM
    return TM, BT_pad


def attention_kernel(keys_ref, mask_ref, wt_ref, v_ref, out_ref):
    # keys_ref : (TM, S_pad, D)  batch of (b,t) slices
    # mask_ref : (TM, S_pad)     1 = valid, 0 = masked (-65000), -1 = padding
    # wt_ref   : (D, D)          W^T (shared across grid)
    # v_ref    : (1, D)          v as a row vector (shared across grid)
    # out_ref  : (TM, D)         lane-dense output slab
    tm, s, d = keys_ref.shape

    # One big MXU matmul for the whole tile: (TM*S, D) @ (D, D); tanh on EUP.
    # (S is padded to a multiple of 8 in the wrapper, so this reshape is a
    #  layout no-op.)
    h = jnp.tanh(
        jnp.dot(keys_ref[...].reshape(tm * s, d), wt_ref[...],
                preferred_element_type=jnp.float32))           # (TM*S, D)

    # v projection as VPU mul + lane (last-axis) reduction -> (TM, S) logits.
    logits = jnp.sum(h.reshape(tm, s, d) * v_ref[...][None, :, :],
                     axis=-1)                                   # (TM, S)

    # masked_fill: real masked positions -> -65000 (matches the reference);
    # padding rows/columns -> -1e30 so they never contribute, even when a real
    # row is fully masked (and underflow to 0 avoids NaNs on padded rows).
    m = mask_ref[...]
    logits = jnp.where(m == 0.0, jnp.float32(-65000.0), logits)
    logits = jnp.where(m < 0.0, jnp.float32(-1e30), logits)

    # Softmax over S with deferred normalization.
    row_max = jnp.max(logits, axis=-1, keepdims=True)           # (TM, 1)
    e = jnp.exp(logits - row_max)                               # (TM, S)
    l = jnp.sum(e, axis=-1, keepdims=True)                      # (TM, 1)

    # Weighted sum over S -> (TM, D). Re-read keys_ref here instead of holding
    # the full (TM,S,D) value live across the matmul/tanh (fresh vld is cheap).
    acc = jnp.sum(e[:, :, None] * keys_ref[...], axis=1)        # (TM, D)
    out_ref[...] = acc * pl.reciprocal(l, approx=False)


def attention_forward(keys, masks, W_weight, v_weight):
    """keys: (B, T, S, D), masks: (B, T, S); returns (B, T, D)."""
    B, T, S, D = keys.shape
    BT = B * T

    vmem_limit, tile_budget = _vmem_limits()

    # Pad S to a sublane multiple so the in-kernel reshapes are layout no-ops.
    S_pad = _round_up(S, 8)

    TM, BT_pad = _choose_tiling(BT, S_pad, D, tile_budget)

    keys_f = keys.reshape(BT, S, D).astype(jnp.float32)
    masks_f = masks.reshape(BT, S).astype(jnp.float32)   # 1 valid / 0 masked

    pad_bt = BT_pad - BT
    pad_s = S_pad - S
    if pad_bt or pad_s:
        keys_f = jnp.pad(keys_f, ((0, pad_bt), (0, pad_s), (0, 0)))
        # Padding rows / columns get mask code -1 (-1e30 logit in the kernel).
        masks_f = jnp.pad(masks_f, ((0, pad_bt), (0, pad_s)),
                          constant_values=-1.0)

    wt = W_weight.T.astype(jnp.float32)                  # (D, D)  == W^T
    v_row = v_weight.reshape(1, D).astype(jnp.float32)   # (1, D)

    flops = (2 * BT_pad * S_pad * D * D        # W matmul
             + 4 * BT_pad * S_pad * D          # v-proj + weighted sum
             + 6 * BT_pad * S_pad)             # mask / softmax
    transcendentals = BT_pad * S_pad * D + BT_pad * S_pad  # tanh + exp
    bytes_accessed = 4 * (BT_pad * S_pad * D + BT_pad * S_pad
                          + D * D + D + BT_pad * D)

    out = pl.pallas_call(
        attention_kernel,
        out_shape=jax.ShapeDtypeStruct((BT_pad, D), jnp.float32),
        grid_spec=pltpu.PrefetchScalarGridSpec(
            num_scalar_prefetch=0,
            grid=(BT_pad // TM,),
            in_specs=[
                pl.BlockSpec((TM, S_pad, D), lambda i: (i, 0, 0)),  # keys
                pl.BlockSpec((TM, S_pad), lambda i: (i, 0)),        # mask
                pl.BlockSpec((D, D), lambda i: (0, 0)),             # W^T
                pl.BlockSpec((1, D), lambda i: (0, 0)),             # v row
            ],
            out_specs=pl.BlockSpec((TM, D), lambda i: (i, 0)),      # lane-dense
        ),
        compiler_params=pltpu.CompilerParams(
            dimension_semantics=("parallel",),
            vmem_limit_bytes=vmem_limit),
        cost_estimate=pl.CostEstimate(
            flops=flops,
            transcendentals=transcendentals,
            bytes_accessed=bytes_accessed),
    )(keys_f, masks_f, wt, v_row)

    return out[:BT].reshape(B, T, D)


def xavier_uniform(key, shape):
    # PyTorch xavier_uniform_ on a Linear weight of shape (out, in)
    fan_out, fan_in = shape
    bound = (6.0 / (fan_in + fan_out)) ** 0.5
    return jax.random.uniform(key, shape, jnp.float32, -bound, bound)


def reference_forward(keys, masks, W_weight, v_weight):
    h = jnp.tanh(jnp.einsum('btsd,ed->btse', keys, W_weight))
    logits = jnp.einsum('btse,oe->btso', h, v_weight)           # (B, T, S, 1)
    logits = jnp.where((1.0 - masks)[..., None] != 0.0, -65000.0, logits)
    w = jax.nn.softmax(logits, axis=2)
    return jnp.sum(w * keys, axis=2)


if __name__ == "__main__":
    B, T, S, D = 2, 4, 8, 32
    root = jax.random.PRNGKey(0)
    k_keys, k_mask, k_w, k_v = jax.random.split(root, 4)

    keys = jax.random.normal(k_keys, (B, T, S, D), dtype=jnp.float32)
    masks = (jax.random.uniform(k_mask, (B, T, S)) > 0.3).astype(jnp.float32)
    masks = masks.at[..., 0].set(1.0)   # keep at least one valid position per row

    W_weight = xavier_uniform(k_w, (D, D))   # Linear(dim, dim, bias=False).weight
    v_weight = xavier_uniform(k_v, (1, D))   # Linear(dim, 1, bias=False).weight

    out = attention_forward(keys, masks, W_weight, v_weight)
    out = jax.block_until_ready(out)

    ref = reference_forward(keys, masks, W_weight, v_weight)
    assert out.shape == (B, T, D)
    assert jnp.allclose(out, ref, atol=1e-5, rtol=1e-5), "mismatch vs reference"

    print("KERNEL_OK")
</pallas_src>

<mosaic_0001>
module attributes {stable_mosaic.version = 11 : i64} {
  func.func @attention_kernel(%arg0: i32, %arg1: memref<8x8x32xf32, #tpu.memory_space<vmem>>, %arg2: memref<8x8xf32, #tpu.memory_space<vmem>>, %arg3: memref<32x32xf32, #tpu.memory_space<vmem>>, %arg4: memref<1x32xf32, #tpu.memory_space<vmem>>, %arg5: memref<8x32xf32, #tpu.memory_space<vmem>>) attributes {dimension_semantics = [#tpu.dimension_semantics<parallel>], iteration_bounds = array<i64: 2>, scalar_prefetch = 0 : i64, scratch_operands = 0 : i64, tpu.core_type = #tpu.core_type<tc>, window_params = [{transform_indices = @transform_0, window_bounds = array<i64: 8, 8, 32>}, {transform_indices = @transform_1, window_bounds = array<i64: 8, 8>}, {pipeline_mode = #tpu.pipeline_mode<synchronous>, transform_indices = @transform_2, window_bounds = array<i64: 32, 32>}, {pipeline_mode = #tpu.pipeline_mode<synchronous>, transform_indices = @transform_3, window_bounds = array<i64: 1, 32>}, {transform_indices = @transform_4, window_bounds = array<i64: 8, 32>}]} {
    %c0 = arith.constant 0 : index
    %c0_0 = arith.constant 0 : index
    %c0_1 = arith.constant 0 : index
    %0 = vector.load %arg1[%c0, %c0_0, %c0_1] : memref<8x8x32xf32, #tpu.memory_space<vmem>>, vector<8x8x32xf32>
    %1 = vector.shape_cast %0 : vector<8x8x32xf32> to vector<64x32xf32>
    %c0_2 = arith.constant 0 : index
    %c0_3 = arith.constant 0 : index
    %2 = vector.load %arg3[%c0_2, %c0_3] : memref<32x32xf32, #tpu.memory_space<vmem>>, vector<32x32xf32>
    %cst = arith.constant dense<0.000000e+00> : vector<64x32xf32>
    %3 = tpu.matmul %1, %2, %cst {dimension_numbers = #tpu.dot_dimension_numbers<[1], [0], [0], [1], [0, 0, 1, 1], [], []>} : vector<64x32xf32>, vector<32x32xf32>, vector<64x32xf32> -> vector<64x32xf32>
    %4 = math.tanh %3 : vector<64x32xf32>
    %5 = vector.shape_cast %4 : vector<64x32xf32> to vector<8x8x32xf32>
    %c0_4 = arith.constant 0 : index
    %c0_5 = arith.constant 0 : index
    %6 = vector.load %arg4[%c0_4, %c0_5] : memref<1x32xf32, #tpu.memory_space<vmem>>, vector<1x32xf32>
    %7 = vector.shape_cast %6 : vector<1x32xf32> to vector<1x1x32xf32>
    %8 = vector.broadcast %7 : vector<1x1x32xf32> to vector<8x8x32xf32>
    %9 = arith.mulf %5, %8 : vector<8x8x32xf32>
    %cst_6 = arith.constant dense<0.000000e+00> : vector<8x8xf32>
    %10 = vector.multi_reduction <add>, %9, %cst_6 [2] : vector<8x8x32xf32> to vector<8x8xf32>
    %c0_7 = arith.constant 0 : index
    %c0_8 = arith.constant 0 : index
    %11 = vector.load %arg2[%c0_7, %c0_8] : memref<8x8xf32, #tpu.memory_space<vmem>>, vector<8x8xf32>
    %cst_9 = arith.constant 0.000000e+00 : f32
    %12 = vector.broadcast %cst_9 : f32 to vector<8x8xf32>
    %13 = arith.cmpf oeq, %11, %12 : vector<8x8xf32>
    %cst_10 = arith.constant -6.500000e+04 : f32
    %14 = vector.broadcast %cst_10 : f32 to vector<8x8xf32>
    %15 = arith.select %13, %14, %10 : vector<8x8xi1>, vector<8x8xf32>
    %cst_11 = arith.constant 0.000000e+00 : f32
    %16 = vector.broadcast %cst_11 : f32 to vector<8x8xf32>
    %17 = arith.cmpf olt, %11, %16 : vector<8x8xf32>
    %cst_12 = arith.constant -1.000000e+30 : f32
    %18 = vector.broadcast %cst_12 : f32 to vector<8x8xf32>
    %19 = arith.select %17, %18, %15 : vector<8x8xi1>, vector<8x8xf32>
    %cst_13 = arith.constant dense<0xFF800000> : vector<8xf32>
    %20 = vector.multi_reduction <maximumf>, %19, %cst_13 [1] : vector<8x8xf32> to vector<8xf32>
    %21 = vector.shape_cast %20 : vector<8xf32> to vector<8x1xf32>
    %22 = vector.broadcast %21 : vector<8x1xf32> to vector<8x8xf32>
    %23 = arith.subf %19, %22 : vector<8x8xf32>
    %24 = math.exp %23 : vector<8x8xf32>
    %cst_14 = arith.constant dense<0.000000e+00> : vector<8xf32>
    %25 = vector.multi_reduction <add>, %24, %cst_14 [1] : vector<8x8xf32> to vector<8xf32>
    %26 = vector.shape_cast %25 : vector<8xf32> to vector<8x1xf32>
    %27 = vector.shape_cast %24 : vector<8x8xf32> to vector<8x8x1xf32>
    %c0_15 = arith.constant 0 : index
    %c0_16 = arith.constant 0 : index
    %c0_17 = arith.constant 0 : index
    %28 = vector.load %arg1[%c0_15, %c0_16, %c0_17] : memref<8x8x32xf32, #tpu.memory_space<vmem>>, vector<8x8x32xf32>
    %29 = vector.broadcast %27 : vector<8x8x1xf32> to vector<8x8x32xf32>
    %30 = arith.mulf %29, %28 : vector<8x8x32xf32>
    %cst_18 = arith.constant dense<0.000000e+00> : vector<8x32xf32>
    %31 = vector.multi_reduction <add>, %30, %cst_18 [1] : vector<8x8x32xf32> to vector<8x32xf32>
    %32 = tpu.reciprocal %26 : vector<8x1xf32> -> vector<8x1xf32>
    %33 = vector.broadcast %32 : vector<8x1xf32> to vector<8x32xf32>
    %34 = arith.mulf %31, %33 : vector<8x32xf32>
    %c0_19 = arith.constant 0 : index
    %c0_20 = arith.constant 0 : index
    %35 = vector.load %arg5[%c0_19, %c0_20] : memref<8x32xf32, #tpu.memory_space<vmem>>, vector<8x32xf32>
    tpu.vector_store %arg5[%c0_19, %c0_20], %34 {strides = array<i32>} : memref<8x32xf32, #tpu.memory_space<vmem>>, vector<8x32xf32>,
    return
  }
  func.func @transform_0(%arg0: i32) -> (i32, i32, i32) {
    %c0_i32 = arith.constant 0 : i32
    %c0_i32_0 = arith.constant 0 : i32
    %c0_i32_1 = arith.constant 0 : i32
    return %arg0, %c0_i32, %c0_i32_0 : i32, i32, i32
  }
  func.func @transform_1(%arg0: i32) -> (i32, i32) {
    %c0_i32 = arith.constant 0 : i32
    %c0_i32_0 = arith.constant 0 : i32
    return %arg0, %c0_i32 : i32, i32
  }
  func.func @transform_2(%arg0: i32) -> (i32, i32) {
    %c0_i32 = arith.constant 0 : i32
    %c0_i32_0 = arith.constant 0 : i32
    %c0_i32_1 = arith.constant 0 : i32
    return %c0_i32, %c0_i32_0 : i32, i32
  }
  func.func @transform_3(%arg0: i32) -> (i32, i32) {
    %c0_i32 = arith.constant 0 : i32
    %c0_i32_0 = arith.constant 0 : i32
    %c0_i32_1 = arith.constant 0 : i32
    return %c0_i32, %c0_i32_0 : i32, i32
  }
  func.func @transform_4(%arg0: i32) -> (i32, i32) {
    %c0_i32 = arith.constant 0 : i32
    %c0_i32_0 = arith.constant 0 : i32
    return %arg0, %c0_i32 : i32, i32
  }
}

</mosaic_0001>

<bundles_post_ra>
// kernel: tpu_custom_call.1
= control target key start
LH: loop header
LB: loop body
LE: loop exit
PB: predicated region body
PF: predicated region fallthrough
CT: control target
= control target key end

     0   :  { %9 = vsyncpa [#allocation3], 0  ;;  %s1370_s0 = inlined_call_operand.hbm [shape: f32[16,8,32], index: 0, kind: input, shape index: {}]   ;;  %s1371_s1 = inlined_call_operand.vmem [shape: f32[16,8], index: 1, kind: input, shape index: {}]   ;;  %s1372_s2 = inlined_call_operand.hbm [shape: f32[32,32], index: 2, kind: input, shape index: {}]   ;;  %s1373_s3 = inlined_call_operand.vmem [shape: f32[1,32], index: 3, kind: input, shape index: {}]   ;;  %s1374_s4 = inlined_call_operand.hbm [shape: f32[16,32], index: 4, kind: output, shape index: {}]  }
   0x1   :  { %11 = vsyncpa [#allocation3 + $0x1], 0 }
   0x2   :  { %12 = vsyncpa [#allocation6], 0 }
   0x3   :  { %13 = vsyncpa [#allocation4], 0 }
   0x4   :  { %15 = vsyncpa [#allocation4 + $0x1], 0  ;;  %s1084_s15 = smov 0   ;;  %s1086_s16 = smov 0  }
   0x5   :  { %s1088_s17 = smov 0   ;;  %s1090_s18 = smov 0  }
   0x6 LB: > { %s1105_s19 = sadd.s32 4294967295, %s1052_s18   ;;  %s785_s20 = sadd.s32 4294967294, %s1052_s18   ;;  %s1052_s18 = sphi %s1090_s18, %s1396_s18   ;;  %s1048_s17 = sphi %s1088_s17, %s1395_s17   ;;  %s1044_s16 = sphi %s1086_s16, %s1394_s16   ;;  %s1040_s15 = sphi %s1084_s15, %s1393_s15  }
   0x7   : > { %p41_p0 = scmp.ne.s32.totalorder %s1044_s16, %s1040_s15  ;;  %p1375_p1 = scmp.eq.s32.totalorder %s1105_s19, 0 }
   0x8   : > { %p139_p3 = scmp.eq.s32.totalorder %s785_s20, 1  ;;  %p786_p5 = scmp.ge.s32.totalorder %s1052_s18, 1 }
   0x9   : > { %p1114_p4 = por %p1375_p1, %p41_p0  ;;  %p146_p7 = scmp.lt.s32.totalorder %s1052_s18, 3 }
   0xa   : > { %p1119_p6 = por %p139_p3, %p41_p0  ;;  %s1054_s24 = smov [#allocation5]  }
   0xb   : > { %s1379_s21 = scalar_select %p1114_p4, 1, 0 }
   0xc   : > { %s1380_s22 = scalar_select %p1119_p6, 1, 0 }
   0xd   : > { %p1124_p8 = pnand %p786_p5, %p146_p7  ;;  %s158_s25 = sshll.u32 %s1054_s24, 4  ;;  %s159_s25 = int_to_ptr.vmem [resolvable:$true] %s158_s25 }
   0xe   : > { %s1138_s27 = sadd.s32 1, %s1052_s18   ;;  %s28_s28 = sadd.s32 1, %s1048_s17 }
   0xf   : > { %s1381_s23 = scalar_select %p1124_p8, 1, 0 }
  0x10   : > { %p859_p9 = pneg %p1124_p8  ;;  %s25_s29 = ssub.s32 %s1052_s18, %s1138_s27 }
  0x11   : > { %s941_s30 = scalar_lea.vmem %s159_s25, 512  ;;  %p949_p5 = scmp.lt.s32.totalorder %s159_s25, %s159_s25 }
  0x12   : > { %p1133_p11 = pnand %p859_p9, %p1375_p1  ;;  %p942_p13 = scmp.ne.s32.totalorder %s159_s25, %s941_s30 }
  0x13   : > { %p950_p7 = scmp.lt.s32.totalorder %s941_s30, %s941_s30 }
  0x14   : > { %p932_p12 = pneg %p1133_p11 }
  0x15   : > { %p951_p10 = por %p950_p7, %p949_p5 }
  0x16   : > { %p944_p0 = pnand %p942_p13, %p932_p12 }
  0x18   : > { %p945_p3 = pneg %p944_p0 }
  0x1a   : > { %p952_p2 = pnand %p951_p10, %p945_p3 }
  0x1c   : > { %955 = shalt.err (!%p952_p2)
}
  0x1d   : > { %s1055_s5 = smov 128   ;;  %s1056_s6 = smov 8  }
  0x1e   : > { %862 = dma.hbm_to_vmem [thread:$0]  (!%p1133_p11), %s1372_s2, 512, %s159_s25, [#allocation6], %s1055_s5, %s1055_s5, %s1056_s6  }
  0x1f   : > { %p26_p2 = scmp.eq.s32.totalorder %s25_s29, 0  ;;  %p35_p9 = scmp.ne.s32.totalorder %s1048_s17, %s1044_s16 }
  0x20   : > { %p36_p10 = scmp.eq.s32.totalorder %s1052_s18, 0  ;;  %p872_p12 = scmp.lt.s32.totalorder %s1052_s18, 2 }
  0x21   : > { %s1158_s9 = scalar_select %p26_p2, %s1048_s17, %s28_s28  }
  0x22   : > { %p37_p13 = por %p36_p10, %p35_p9  ;;  %p1383_p0 = scmp.eq.s32.totalorder %s1105_s19, 1 }
  0x23   : > { %s175_s11 = sand.u32 1, %s1048_s17   ;;  %s810_s12 = sshll.u32 %s1052_s18, 10 }
  0x24   : > { %p1162_p3 = por %p1383_p0, %p35_p9  ;;  %s789_s13 = sshll.u32 %s175_s11, 6 }
  0x25   : > { %s1171_s24 = scalar_lea.hbm %s1370_s0, %s810_s12  ;;  %s179_s25 = scalar_lea.vmem [#allocation2], %s789_s13 }
  0x26   : > { %s1384_s10 = scalar_select %p1162_p3, 1, 0 }
  0x27   : > { %s186_s26 = sshll.u32 %s179_s25, 4  ;;  %p1173_p11 = pnand %p872_p12, %p37_p13  ;;  %s1177_s26 = int_to_ptr.vmem [resolvable:$true] %s186_s26 }
  0x28   : > { %s1179_s29 = scalar_lea.sflag [#allocation3], %s175_s11  ;;  %s956_s30 = scalar_lea.hbm %s1171_s24, 1024 }
  0x29   : > { %p957_p5 = scmp.ne.s32.totalorder %s1171_s24, %s956_s30  ;;  %p958_p7 = pneg %p1173_p11 }
  0x2a   : > { %s961_s12 = scalar_lea.hbm %s1370_s0, 2048  ;;  %p962_p10 = scmp.lt.s32.totalorder %s1171_s24, %s1370_s0 }
  0x2b   : > { %p959_p2 = pnand %p958_p7, %p957_p5  ;;  %p963_p12 = scmp.lt.s32.totalorder %s961_s12, %s956_s30 }
  0x2d   : > { %p960_p9 = pneg %p959_p2  ;;  %p964_p13 = por %p963_p12, %p962_p10 }
  0x2f   : > { %p965_p0 = pnand %p964_p13, %p960_p9 }
  0x31   : > { %968 = shalt.err (!%p965_p0)
}
  0x32   : > { %s969_s11 = scalar_lea.vmem %s1177_s26, 1024  ;;  %s1057_s20 = smov [#allocation2]  }
  0x33   : > { %p970_p1 = scmp.ne.s32.totalorder %s1177_s26, %s969_s11  ;;  %s974_s25 = sshll.u32 %s1057_s20, 4  ;;  %s975_s25 = int_to_ptr.vmem [resolvable:$false] %s974_s25 }
  0x34   : > { %s976_s7 = scalar_lea.vmem %s975_s25, 2048  ;;  %p977_p2 = scmp.lt.s32.totalorder %s1177_s26, %s975_s25 }
  0x35   : > { %p972_p6 = pnand %p970_p1, %p958_p7  ;;  %p978_p3 = scmp.lt.s32.totalorder %s976_s7, %s969_s11 }
  0x37   : > { %p973_p5 = pneg %p972_p6  ;;  %p979_p4 = por %p978_p3, %p977_p2 }
  0x39   : > { %p980_p8 = pnand %p979_p4, %p973_p5 }
  0x3b   : > { %983 = shalt.err (!%p980_p8)
}
  0x3c   : > { %866 = dma.hbm_to_vmem [thread:$0]  (!%p1173_p11), %s1171_s24, 1024, %s1177_s26, %s1179_s29, %s1055_s5, %s1055_s5, %s1056_s6  }
  0x3d   : > { %p1386_p1 = scmp.ne.s32.totalorder %s1381_s23, 0 }
  0x3e   : > { %s1206_s30 = sand.u32 (!%p1386_p1), 1, %s1044_s16   ;;  %p1387_p4 = scmp.ne.s32.totalorder (!%p1386_p1), %s1379_s21, 0 }
  0x3f   : > { %205 = sbr.rel (%p1386_p1) target bundleno = 799 (0x31f), region = 36  ;;  %s793_s8 = sshll.u32 (!%p1386_p1), %s1206_s30, 6 }
  0x40   : > { %s208_s12 = scalar_lea.sflag (!%p1386_p1), [#allocation3], %s1206_s30  ;;  %s1210_s13 = scalar_lea.vmem (!%p1386_p1), [#allocation2], %s793_s8 }
  0x44   : > { %1027 = dma.done.wait (%p1387_p4), %s208_s12, 1024  }
  0x45   : > { %1029 = vsyncadd (%p1387_p4), %s208_s12, 4294966272  ;;  %p1388_p6 = scmp.eq.s32.totalorder %s1105_s19, 0 }
  0x47   : > { %1031 = dma.done.wait (%p1388_p6), [#allocation6], 512   ;;  %p1389_p8 = pmov %p1388_p6 }
  0x48   : > { %vm261_vm0 = vcmask 261120   ;;  %v260_v0 = vld [vmem:[#allocation5 + $0x18] sm:$0xff]  ;;  %v259_v1 = vld [vmem:[#allocation5 + $0x10] sm:$0xff]  ;;  %v1221_v2 = vld [vmem:[%s1210_s13] sm:$0xff]  ;;  %v448_v45 = vlaneseq  ;;  %p245_p3 = scmp.lt.s32.totalorder %s1105_s19, 1  ;;  %vm482_vm1 = vcmask 1041409  }
  0x49   : > { %1033 = vsyncadd (%p1389_p8), [#allocation6], 4294966784  ;;  %823 = vmatprep.subr.mxu0 %v260_v0  ;;  %843 = vmatprep.subr.mxu1 %v260_v0  ;;  %v258_v3 = vld [vmem:[#allocation5 + $0x8] sm:$0xff]  ;;  %v257_v4 = vld [vmem:[#allocation5] sm:$0xff]  ;;  %vm484_vm2 = vcmask 1042434   ;;  %vm486_vm3 = vcmask 1043459  }
  0x4a   : > { %824 = vmatpush3.msra.mxu0 %v260_v0  ;;  %831 = vmatprep.mubr.msk.f32.mxu0 %vm261_vm0, %v1221_v2  ;;  %v1226_v5 = vld [vmem:[%s1210_s13 + $0x8] sm:$0xff]  ;;  %v1229_v6 = vld [vmem:[%s1210_s13 + $0x10] sm:$0xff]  ;;  %v1232_v7 = vld [vmem:[%s1210_s13 + $0x20] sm:$0xff]  ;;  %v449_v46 = vand.u32 127, %v448_v45  ;;  %v1271_v47 = vshrl.u32 %v448_v45, 7  ;;  %s246_s5 = scalar_select %p245_p3, %s1105_s19, 1 }
  0x4b   : > { %825 = vmatprep.subr.mxu0 %v259_v1  ;;  %847 = vmatpush3.msra.mxu1 %v260_v0  ;;  %v1235_v8 = vld [vmem:[%s1210_s13 + $0x28] sm:$0xff]  ;;  %v1240_v9 = vld [vmem:[%s1210_s13 + $0x30] sm:$0xff]  ;;  %v1245_v10 = vld [vmem:[%s1210_s13 + $0x18] sm:$0xff]  ;;  %vm488_vm4 = vcmask 1044484   ;;  %vm490_vm5 = vcmask 1045509   ;;  %vm492_vm6 = vcmask 1046534  }
  0x4c   : > { %826 = vmatpush3.msra.mxu0 %v259_v1  ;;  %844 = vmatprep.subr.mxu1 %v259_v1  ;;  %v1254_v11 = vld [vmem:[%s1210_s13 + $0x38] sm:$0xff]  ;;  %v805_v20 = vld [vmem:[%s1373_s3] ss:$0 sm:$0xff]  ;;  %v452_v49 = vsub.s32 %v449_v46, %v1271_v47  ;;  %s796_s6 = sshll.u32 %s246_s5, 3  ;;  %vm494_vm7 = vcmask 1047559   ;;  %vm500_vm10 = vcmask 64512  }
  0x4d   : > { %827 = vmatprep.subr.mxu0 %v258_v3  ;;  %848 = vmatpush3.msra.mxu1 %v259_v1  ;;  %s248_s28 = scalar_lea.vmem %s1371_s1, %s796_s6  ;;  %s795_s29 = sshll.u32 %s1206_s30, 3 }
  0x4e   : > { %828 = vmatpush3.msra.mxu0 %v258_v3  ;;  %845 = vmatprep.subr.mxu1 %v258_v3  ;;  %s807_s14 = sshll.u32 %s1105_s19, 7  ;;  %s243_s11 = scalar_lea.vmem [#allocation7], %s795_s29 }
  0x4f   : > { %829 = vmatprep.subr.mxu0 %v257_v4  ;;  %849 = vmatpush3.msra.mxu1 %v258_v3  ;;  %s693_s20 = sshll.u32 %s243_s11, 4  ;;  %s1331_s8 = scalar_lea.hbm %s1374_s4, %s807_s14  ;;  %s694_s20 = int_to_ptr.vmem [resolvable:$true] %s693_s20 }
  0x50   : > { %830 = vmatpush3.msra.mxu0 %v257_v4  ;;  %846 = vmatprep.subr.mxu1 %v257_v4  ;;  %s680_s12 = scalar_lea.sflag [#allocation4], %s1206_s30  ;;  %s984_s13 = scalar_lea.vmem %s694_s20, 128 }
  0x51   : > { %832 = vmatmul.mubr.msk.f32.vlgmr.msra.gmra.mxu0 %vm261_vm0, %v1226_v5  ;;  %850 = vmatpush3.msra.mxu1 %v257_v4  ;;  %v438_v4 = vld [vmem:[%s248_s28] sm:$0xff]  ;;  %p985_p11 = scmp.ne.s32.totalorder %s694_s20, %s984_s13  ;;  %p1390_p7 = scmp.ne.s32.totalorder %s1384_s10, 0 }
  0x52   : > { %834 = vmatprep.mubr.msk.f32.mxu0 %vm261_vm0, %v1229_v6  ;;  %837 = vmatprep.mubr.msk.f32.mxu1 %vm261_vm0, %v1232_v7  ;;  %vm439_vm8 = vcmp.eq.f32.partialorder %v438_v4, 0.0  ;;  %vm498_vm9 = vcmp.lt.f32.partialorder %v438_v4, 0.0  ;;  %s1058_s19 = smov [#allocation7]  }
  0x53   : > { %838 = vmatmul.mubr.msk.f32.vlgmr.msra.gmra.mxu1 %vm261_vm0, %v1235_v8  ;;  %p986_p9 = pnand %p985_p11, %p1390_p7  ;;  %s988_s21 = sshll.u32 %s1058_s19, 4  ;;  %s989_s21 = int_to_ptr.vmem [resolvable:$false] %s988_s21 }
  0x54   : > { %840 = vmatprep.mubr.msk.f32.mxu1 %vm261_vm0, %v1240_v9  ;;  %s990_s23 = scalar_lea.vmem %s989_s21, 256  ;;  %p991_p12 = scmp.lt.s32.totalorder %s694_s20, %s989_s21 }
  0x55   : > { %835 = vmatmul.mubr.msk.f32.gmra.mxu0 %vm261_vm0, %v1245_v10  ;;  %p987_p10 = pneg %p986_p9  ;;  %p992_p13 = scmp.lt.s32.totalorder %s990_s23, %s984_s13 }
  0x57   : > { %841 = vmatmul.mubr.msk.f32.gmra.mxu1 %vm261_vm0, %v1254_v11  ;;  %p993_p0 = por %p992_p13, %p991_p12 }
  0x59   : > { %p994_p5 = pnand %p993_p0, %p987_p10 }
 0x111   : > { %v833_v12 = vpop.f32.mrf.mxu0 }
 0x112   : > { %910 = vtanh.f32 %v833_v12 }
 0x113   : > { %v352_v13 = vpop.f32.mrf.mxu0  ;;  %v839_v14 = vpop.f32.mrf.mxu1 }
 0x114   : > { %912 = vtanh.f32 %v352_v13 }
 0x115   : > { %v836_v15 = vpop.f32.mrf.mxu0  ;;  %v372_v16 = vpop.f32.mrf.mxu1 }
 0x116   : > { %914 = vtanh.f32 %v836_v15 }
 0x117   : > { %v362_v17 = vpop.f32.mrf.mxu0  ;;  %916 = vtanh.f32 %v372_v16  ;;  %v842_v18 = vpop.f32.mrf.mxu1 }
 0x118   : > { %918 = vtanh.f32 %v362_v17 }
 0x119   : > { %920 = vtanh.f32 %v839_v14  ;;  %v382_v19 = vpop.f32.mrf.mxu1 }
 0x11a   : > { %922 = vtanh.f32 %v382_v19 }
 0x11b   : > { %924 = vtanh.f32 %v842_v18 }
 0x11f   : > { %v911_v21 = vpop.eup %910 }
 0x120   : > { %v407_v22 = vmul.f32 %v911_v21, %v805_v20 }
 0x121   : > { %v913_v23 = vpop.eup %912 }
 0x122   : > { %v417_v24 = vsel %vm261_vm0, %v407_v22, 0.0  ;;  %v406_v25 = vmul.f32 %v913_v23, %v805_v20  ;;  %v519_v23 = vsub.s32 1, %v1271_v47 }
 0x123   : > { %v915_v26 = vpop.eup %914  ;;  %418 = vadd.xlane.f32.xlu0 %v417_v24 }
 0x124   : > { %v917_v27 = vpop.eup %916  ;;  %v409_v28 = vmul.f32 %v915_v26, %v805_v20  ;;  %v414_v32 = vsel %vm261_vm0, %v406_v25, 0.0 }
 0x125   : > { %v919_v29 = vpop.eup %918  ;;  %v410_v30 = vmul.f32 %v917_v27, %v805_v20  ;;  %v540_v27 = vsub.s32 4, %v1271_v47 }
 0x126   : > { %v921_v31 = vpop.eup %920  ;;  %v423_v33 = vsel %vm261_vm0, %v409_v28, 0.0  ;;  %v408_v34 = vmul.f32 %v919_v29, %v805_v20  ;;  %v554_v29 = vsub.s32 6, %v1271_v47 }
 0x127   : > { %v923_v35 = vpop.eup %922  ;;  %415 = vadd.xlane.f32.xlu0 %v414_v32  ;;  %424 = vadd.xlane.f32.xlu1 %v423_v33  ;;  %v426_v36 = vsel %vm261_vm0, %v410_v30, 0.0  ;;  %v411_v39 = vmul.f32 %v921_v31, %v805_v20  ;;  %v526_v31 = vsub.s32 2, %v1271_v47  ;;  %v512_v33 = vsub.s32 0, %v1271_v47 }
 0x128   : > { %v412_v37 = vmul.f32 %v923_v35, %v805_v20  ;;  %v420_v38 = vsel %vm261_vm0, %v408_v34, 0.0  ;;  %v925_v40 = vpop.eup %924  ;;  %v533_v35 = vsub.s32 3, %v1271_v47 }
 0x129   : > { %v429_v42 = vsel %vm261_vm0, %v411_v39, 0.0  ;;  %v413_v43 = vmul.f32 %v925_v40, %v805_v20  ;;  %v561_v39 = vsub.s32 7, %v1271_v47 }
 0x12a   : > { %v432_v41 = vsel %vm261_vm0, %v412_v37, 0.0  ;;  %v547_v37 = vsub.s32 5, %v1271_v47 }
 0x12b   : > { %421 = vadd.xlane.f32.xlu1 %v420_v38  ;;  %427 = vadd.xlane.f32.xlu0 %v426_v36  ;;  %v435_v44 = vsel %vm261_vm0, %v413_v43, 0.0 }
 0x12f   : > { %430 = vadd.xlane.f32.xlu1 %v429_v42  ;;  %433 = vadd.xlane.f32.xlu0 %v432_v41 }
 0x133   : > { %436 = vadd.xlane.f32.xlu1 %v435_v44 }
 0x1ac   : > { %v419_v48 = vpop.xlane.xlu0 %418 }
 0x1ad   : > { %v457_v53 = vrot.slane %v419_v48, %v452_v49 }
 0x1b0   : > { %v416_v50 = vpop.xlane.xlu0 %415  ;;  %v425_v51 = vpop.xlane.xlu1 %424 }
 0x1b1   : > { %v453_v52 = vrot.slane %v416_v50, %v452_v49  ;;  %v465_v59 = vrot.slane %v425_v51, %v452_v49 }
 0x1b3   : > { %v483_v58 = vsel %vm482_vm1, %v457_v53, %v453_v52 }
 0x1b4   : > { %v422_v54 = vpop.xlane.xlu1 %421  ;;  %v428_v55 = vpop.xlane.xlu0 %427 }
 0x1b5   : > { %v461_v56 = vrot.slane %v422_v54, %v452_v49  ;;  %v469_v57 = vrot.slane %v428_v55, %v452_v49 }
 0x1b7   : > { %v485_v60 = vsel %vm484_vm2, %v461_v56, %v483_v58 }
 0x1b8   : > { %v487_v61 = vsel %vm486_vm3, %v465_v59, %v485_v60  ;;  %v431_v62 = vpop.xlane.xlu1 %430  ;;  %v434_v63 = vpop.xlane.xlu0 %433 }
 0x1b9   : > { %v489_v0 = vsel %vm488_vm4, %v469_v57, %v487_v61  ;;  %v473_v1 = vrot.slane %v431_v62, %v452_v49  ;;  %v477_v3 = vrot.slane %v434_v63, %v452_v49 }
 0x1bb   : > { %v491_v12 = vsel %vm490_vm5, %v473_v1, %v489_v0 }
 0x1bc   : > { %v437_v13 = vpop.xlane.xlu1 %436  ;;  %v493_v15 = vsel %vm492_vm6, %v477_v3, %v491_v12 }
 0x1bd   : > { %v481_v14 = vrot.slane %v437_v13, %v452_v49 }
 0x1bf   : > { %v495_v16 = vsel %vm494_vm7, %v481_v14, %v493_v15 }
 0x1c0   : > { %v497_v17 = vsel %vm439_vm8, -65000.0, %v495_v16 }
 0x1c1   : > { %v499_v18 = vsel %vm498_vm9, -1e+30, %v497_v17 }
 0x1c2   : > { %v501_v19 = vsel %vm500_vm10, %v499_v18, -inf }
 0x1c3   : > { %502 = vmax.xlane.f32.xlu0 %v501_v19 }
 0x24c   : > { %v503_v20 = vpop.xlane.xlu0 %502 }
 0x24d   : > { %v504_v21 = vsub.f32 %v499_v18, %v503_v20 }
 0x24f   : > { %v505_v22 = vmul.f32 1.442695, %v504_v21 }
 0x251   : > { %926 = vpow2.f32 %v505_v22 }
 0x25e   : > { %v927_v24 = vpop.eup %926 }
 0x25f   : > { %v507_v25 = vsel %vm500_vm10, %v927_v24, 0.0  ;;  %v520_v26 = vrot.slane %v927_v24, %v519_v23  ;;  %v541_v28 = vrot.slane %v927_v24, %v540_v27  ;;  %v555_v30 = vrot.slane %v927_v24, %v554_v29 }
 0x260   : > { %508 = vadd.xlane.f32.xlu1 %v507_v25  ;;  %v527_v32 = vrot.slane %v927_v24, %v526_v31  ;;  %v513_v34 = vrot.slane %v927_v24, %v512_v33  ;;  %v534_v36 = vrot.slane %v927_v24, %v533_v35  ;;  %v548_v38 = vrot.slane %v927_v24, %v547_v37 }
 0x261   : > { %522 = vbcast.lane.b32.xlu0 %v520_v26, 256  ;;  %v562_v40 = vrot.slane %v927_v24, %v561_v39 }
 0x265   : > { %543 = vbcast.lane.b32.xlu0 %v541_v28, 256 }
 0x269   : > { %557 = vbcast.lane.b32.xlu0 %v555_v30, 256 }
 0x271   : > { %529 = vbcast.lane.b32.xlu1 %v527_v32, 256 }
 0x275   : > { %515 = vbcast.lane.b32.xlu1 %v513_v34, 256 }
 0x279   : > { %536 = vbcast.lane.b32.xlu1 %v534_v36, 256 }
 0x27d   : > { %550 = vbcast.lane.b32.xlu1 %v548_v38, 256 }
 0x281   : > { %564 = vbcast.lane.b32.xlu1 %v562_v40, 256 }
 0x2d3   : > { %v523_v41 = vpop.permute.xlu0 %522 }
 0x2d4   : > { %v567_v42 = vmul.f32 %v523_v41, %v1226_v5 }
 0x2d6   : > { %v581_v44 = vsel %vm261_vm0, %v567_v42, 0.0 }
 0x2d7   : > { %v544_v43 = vpop.permute.xlu0 %543  ;;  %v582_v45 = vrot.slane %v581_v44, 4 }
 0x2d8   : > { %v570_v46 = vmul.f32 %v544_v43, %v1232_v7 }
 0x2d9   : > { %v583_v50 = vadd.f32 %v582_v45, %v581_v44 }
 0x2da   : > { %v602_v51 = vsel %vm261_vm0, %v570_v46, 0.0 }
 0x2db   : > { %v558_v49 = vpop.permute.xlu0 %557  ;;  %v603_v54 = vrot.slane %v602_v51, 4  ;;  %v584_v55 = vrot.slane %v583_v50, 2 }
 0x2dc   : > { %v572_v47 = vmul.f32 %v558_v49, %v1240_v9 }
 0x2dd   : > { %v604_v60 = vadd.f32 %v603_v54, %v602_v51  ;;  %v585_v63 = vadd.f32 %v584_v55, %v583_v50 }
 0x2de   : > { %v616_v56 = vsel %vm261_vm0, %v572_v47, 0.0 }
 0x2df   : > { %v617_v61 = vrot.slane %v616_v56, 4  ;;  %v605_v13 = vrot.slane %v604_v60, 2 }
 0x2e1   : > { %v618_v14 = vadd.f32 %v617_v61, %v616_v56 }
 0x2e3   : > { %v619_v24 = vrot.slane %v618_v14, 2 }
 0x2e5   : > { %v620_v37 = vadd.f32 %v619_v24, %v618_v14 }
 0x2e7   : > { %v621_v47 = vrot.slane %v620_v37, 1 }
 0x2e9   : > { %v509_v48 = vpop.xlane.xlu1 %508  ;;  %v622_v61 = vadd.f32 %v621_v47, %v620_v37 }
 0x2ea   : > { %928 = vrcp.f32 %v509_v48 }
 0x2ed   : > { %v530_v52 = vpop.permute.xlu1 %529 }
 0x2ee   : > { %v568_v53 = vmul.f32 %v530_v52, %v1229_v6 }
 0x2f0   : > { %v588_v5 = vsel %vm261_vm0, %v568_v53, 0.0 }
 0x2f1   : > { %v589_v57 = vrot.slane %v588_v5, 4  ;;  %v516_v58 = vpop.permute.xlu1 %515 }
 0x2f2   : > { %v566_v7 = vmul.f32 %v516_v58, %v1221_v2  ;;  %v586_v2 = vrot.slane %v585_v63, 1 }
 0x2f3   : > { %v590_v59 = vadd.f32 %v589_v57, %v588_v5 }
 0x2f4   : > { %v574_v62 = vsel %vm261_vm0, %v566_v7, 0.0  ;;  %v587_v26 = vadd.f32 %v586_v2, %v585_v63 }
 0x2f5   : > { %v591_v9 = vrot.slane %v590_v59, 2  ;;  %v575_v0 = vrot.slane %v574_v62, 4  ;;  %v537_v1 = vpop.permute.xlu1 %536 }
 0x2f6   : > { %v569_v6 = vmul.f32 %v537_v1, %v1245_v10  ;;  %v606_v10 = vadd.f32 %v605_v13, %v604_v60 }
 0x2f7   : > { %v592_v3 = vadd.f32 %v591_v9, %v590_v59  ;;  %v576_v4 = vadd.f32 %v575_v0, %v574_v62  ;;  %v1305_v12 = vpop.eup %928 }
 0x2f8   : > { %v595_v15 = vsel %vm261_vm0, %v569_v6, 0.0  ;;  %v632_v21 = vrot.slane %v1305_v12, 1  ;;  %v607_v36 = vrot.slane %v606_v10, 1  ;;  %v633_v38 = vrot.slane %v1305_v12, 2 }
 0x2f9   : > { %v577_v16 = vrot.slane %v576_v4, 2  ;;  %v596_v17 = vrot.slane %v595_v15, 4  ;;  %v551_v18 = vpop.permute.xlu1 %550  ;;  %v593_v19 = vrot.slane %v592_v3, 1  ;;  %v634_v45 = vrot.slane %v1305_v12, 3 }
 0x2fa   : > { %v571_v20 = vmul.f32 %v551_v18, %v1235_v8  ;;  %v648_v33 = vmul.f32 %v632_v21, %v587_v26  ;;  %v608_v51 = vadd.f32 %v607_v36, %v606_v10  ;;  %v637_v56 = vrot.slane %v1305_v12, 6 }
 0x2fb   : > { %v578_v22 = vadd.f32 %v577_v16, %v576_v4  ;;  %v597_v23 = vadd.f32 %v596_v17, %v595_v15  ;;  %v594_v31 = vadd.f32 %v593_v19, %v592_v3  ;;  %v636_v7 = vrot.slane %v1305_v12, 5 }
 0x2fc   : > { %v609_v25 = vsel %vm261_vm0, %v571_v20, 0.0  ;;  %v663_v46 = vrot.slane %v648_v33, 7  ;;  %v653_v1 = vmul.f32 %v637_v56, %v622_v61  ;;  %v638_v4 = vrot.slane %v1305_v12, 7 }
 0x2fd   : > { %v579_v27 = vrot.slane %v578_v22, 1  ;;  %v598_v28 = vrot.slane %v597_v23, 2  ;;  %v610_v29 = vrot.slane %v609_v25, 4  ;;  %v565_v30 = vpop.permute.xlu1 %564  ;;  %v649_v44 = vmul.f32 %v633_v38, %v594_v31 }
 0x2fe   : > { %v573_v32 = vmul.f32 %v565_v30, %v1254_v11  ;;  %v635_v11 = vrot.slane %v1305_v12, 4  ;;  %v673_v16 = vrot.slane %v653_v1, 2 }
 0x2ff   : > { %v580_v34 = vadd.f32 %v579_v27, %v578_v22  ;;  %v599_v35 = vadd.f32 %v598_v28, %v597_v23  ;;  %v611_v8 = vadd.f32 %v610_v29, %v609_v25  ;;  %v665_v55 = vrot.slane %v649_v44, 6 }
 0x300   : > { %v623_v39 = vsel %vm261_vm0, %v573_v32, 0.0  ;;  %v651_v57 = vmul.f32 %v635_v11, %v608_v51 }
 0x301   : > { %v647_v40 = vmul.f32 %v1305_v12, %v580_v34  ;;  %v600_v41 = vrot.slane %v599_v35, 1  ;;  %v612_v42 = vrot.slane %v611_v8, 2  ;;  %v624_v43 = vrot.slane %v623_v39, 4 }
 0x302   : > { %v669_v6 = vrot.slane %v651_v57, 4 }
 0x303   : > { %v601_v48 = vadd.f32 %v600_v41, %v599_v35  ;;  %v613_v49 = vadd.f32 %v612_v42, %v611_v8  ;;  %v625_v50 = vadd.f32 %v624_v43, %v623_v39  ;;  %v664_v52 = vsel %vm482_vm1, %v663_v46, %v647_v40 }
 0x304   : > { %v666_v62 = vsel %vm484_vm2, %v665_v55, %v664_v52 }
 0x305   : > { %v650_v53 = vmul.f32 %v634_v45, %v601_v48  ;;  %v614_v54 = vrot.slane %v613_v49, 1  ;;  %v626_v5 = vrot.slane %v625_v50, 2 }
 0x307   : > { %v667_v58 = vrot.slane %v650_v53, 5  ;;  %v615_v59 = vadd.f32 %v614_v54, %v613_v49  ;;  %v627_v60 = vadd.f32 %v626_v5, %v625_v50 }
 0x309   : > { %v668_v63 = vsel %vm486_vm3, %v667_v58, %v666_v62  ;;  %v652_v9 = vmul.f32 %v636_v7, %v615_v59  ;;  %v628_v0 = vrot.slane %v627_v60, 1 }
 0x30a   : > { %v670_v14 = vsel %vm488_vm4, %v669_v6, %v668_v63 }
 0x30b   : > { %v671_v3 = vrot.slane %v652_v9, 3  ;;  %v629_v13 = vadd.f32 %v628_v0, %v627_v60 }
 0x30d   : > { %v654_v15 = vmul.f32 %v638_v4, %v629_v13  ;;  %v672_v2 = vsel %vm490_vm5, %v671_v3, %v670_v14 }
 0x30e   : > { %v674_v18 = vsel %vm492_vm6, %v673_v16, %v672_v2 }
 0x30f   : > { %v675_v17 = vrot.slane %v654_v15, 1 }
 0x311   : > { %v676_v12 = vsel %vm494_vm7, %v675_v17, %v674_v18 }
 0x312   : > { %678 = vst.msk [vmem:[%s243_s11] sm:$0xff] %vm261_vm0, %v676_v12 }
 0x313   : > { %997 = shalt.err (!%p994_p5)
}
 0x314   : > { %s998_s5 = scalar_lea.hbm %s1331_s8, 128  ;;  %s1002_s24 = scalar_lea.hbm %s1374_s4, 256 }
 0x315   : > { %p999_p2 = scmp.ne.s32.totalorder %s1331_s8, %s998_s5  ;;  %p1003_p6 = scmp.lt.s32.totalorder %s1331_s8, %s1374_s4 }
 0x316   : > { %p1004_p8 = scmp.lt.s32.totalorder %s1002_s24, %s998_s5 }
 0x317   : > { %p1000_p1 = pnand %p999_p2, %p1390_p7 }
 0x318   : > { %p1005_p3 = por %p1004_p8, %p1003_p6 }
 0x319   : > { %p1001_p4 = pneg %p1000_p1 }
 0x31b   : > { %p1006_p11 = pnand %p1005_p3, %p1001_p4 }
 0x31d   : > { %1009 = shalt.err (!%p1006_p11)
}
 0x31e   : > { %857 = dma.vmem_to_hbm [thread:$0]  (%p1390_p7), %s694_s20, 128, %s1331_s8, %s680_s12  }
 0x31f PF: > { %s705_s29 = sand.u32 1, %s1040_s15   ;;  %p1391_p9 = scmp.ne.s32.totalorder %s1380_s22, 0 }
 0x320   : > { %p1392_p10 = scmp.ge.s32.totalorder %s1052_s18, 2  ;;  %s706_s14 = scalar_lea.sflag [#allocation4], %s705_s29 }
 0x322   : > { %p868_p12 = pnand %p1392_p10, %p1391_p9 }
 0x324   : > { %p869_p13 = pneg %p868_p12 }
 0x326   : > { %1035 = dma.done.wait (%p869_p13), %s706_s14, 128  }
 0x327   : > { %1037 = vsyncadd (%p869_p13), %s706_s14, 4294967168  ;;  %p18_p0 = scmp.ge.s32.totalorder %s1138_s27, 4   ;;  %s1393_s15 = smov %s1044_s16 }
 0x328   : > { %s1394_s16 = smov %s1048_s17  ;;  %s1395_s17 = smov %s1158_s9 }
 0x329   : > { %s1396_s18 = smov %s1138_s27  ;;  %20 = sbr.rel (!%p18_p0) target bundleno = 6 (0x6), region = 88 }
 0x32e   :  { %711 = vsyncpa [#allocation3], 1 }
 0x32f   :  { %713 = vsyncpa [#allocation3 + $0x1], 1 }
 0x330   :  { %714 = vsyncpa [#allocation6], 1 }
 0x331   :  { %715 = vsyncpa [#allocation4], 1 }
 0x332   :  { %717 = vsyncpa [#allocation4 + $0x1], 1 }

</bundles_post_ra>
